<compile_context>
chip_gen: v7x
topology: tpu7x:2x2x1
jax: 0.10.0
libtpu: 0.0.40
codegen_flags: <defaults>
</compile_context>

<pallas_src>
import jax
import jax.numpy as jnp
from jax.experimental import pallas as pl
from jax.experimental.pallas import tpu as pltpu

EPS = 1e-6


def _vmem_capacity_bytes():
    """Physical VMEM of the current generation (conservative 64 MiB fallback)."""
    try:
        info = pltpu.get_tpu_info()
        for name in ("vmem_capacity_bytes", "vmem_size_bytes", "vmem_bytes"):
            v = getattr(info, name, None)
            if v:
                return int(v)
    except Exception:
        pass
    return 64 << 20


def _pick_tiles(B, S, D, dtype_bytes, vmem_cap):
    """Choose (b_tile, s_tile, n_b, n_s) for the (B, E, S, D) input."""
    # Sublane pack for the dtype: 8 rows for 4-byte, 16 for 2-byte, 32 for 1-byte.
    pack = 8 * max(1, 4 // dtype_bytes)
    row_bytes_io = D * dtype_bytes
    # Per-row VMEM footprint: double-buffered in + out tiles (input dtype) plus
    # ~3 full-tile f32 temps live inside the kernel body.
    row_bytes_vmem = D * (4 * dtype_bytes + 3 * 4)

    # Generation-aware per-buffer tile target (HBM-bound: bigger slabs amortize
    # the ~0.35 us/step pipeline overhead; diminishing returns past ~4-8 MiB).
    target = (8 << 20) if vmem_cap >= (128 << 20) else (4 << 20)
    budget = max(8 << 20, vmem_cap - (16 << 20))  # leave compiler headroom

    max_rows = min(target // row_bytes_io, budget // row_bytes_vmem)
    max_rows = max(pack, (max_rows // pack) * pack)

    if S <= max_rows:
        # Whole S fits in one slab; fold multiple batches into the same block.
        s_tile = S  # full-dim block is always legal, regardless of pack
        b_tile = max(1, min(B, max_rows // max(S, 1)))
        while b_tile > 1 and B % b_tile:  # keep a clean divisor of B
            b_tile -= 1
    else:
        b_tile = 1
        s_tile = 0
        t = max_rows
        while t >= pack:  # largest pack-aligned divisor of S under the target
            if S % t == 0:
                s_tile = t
                break
            t -= pack
        if s_tile == 0:
            # Awkward S: non-divisor tile + cdiv grid.  The padded last block is
            # harmless (rows are independent, reduction is along the full D).
            s_tile = max_rows

    n_b = pl.cdiv(B, b_tile)  # exact (divisor) by construction
    n_s = pl.cdiv(S, s_tile)
    return b_tile, s_tile, n_b, n_s


def _block_expert_ln_kernel(x_ref, w_ref, b_ref, o_ref):
    # x_ref/o_ref: (b_tile, s_tile, D); w_ref/b_ref: (1, D)
    x = x_ref[...].astype(jnp.float32)
    mean = jnp.mean(x, axis=-1, keepdims=True)         # (b_tile, s_tile, 1)
    xc = x - mean
    var = jnp.mean(xc * xc, axis=-1, keepdims=True)    # population var (unbiased=False)
    # eps added to std (matches the module: (x - mean) / (std + eps)).
    # Exact reciprocal on the narrow (..., 1) column; broadcast-multiply across D.
    inv = 1.0 / (jnp.sqrt(var) + EPS)
    xn = xc * inv
    w = w_ref[...].astype(jnp.float32)                  # (1, D) -> broadcasts
    b = b_ref[...].astype(jnp.float32)
    o_ref[...] = (xn * w + b).astype(o_ref.dtype)


def block_expert_layernorm(x, weight, bias):
    """x: (B, E, S, D); weight, bias: (E, D). Returns (B, E, S, D)."""
    B, E, S, D = x.shape
    dtype_bytes = jnp.dtype(x.dtype).itemsize
    vmem_cap = _vmem_capacity_bytes()
    b_tile, s_tile, n_b, n_s = _pick_tiles(B, S, D, dtype_bytes, vmem_cap)

    w3 = weight.reshape(E, 1, D)
    b3 = bias.reshape(E, 1, D)

    # Actual VMEM requirement (not a loose heuristic): double-buffered in + out
    # tiles, ~3 f32 full-tile temps, double-buffered w/b, plus scratch margin.
    tile_rows = b_tile * s_tile
    tile_io_bytes = tile_rows * D * dtype_bytes
    wb_bytes = 4 * D * jnp.dtype(weight.dtype).itemsize
    vmem_need = 4 * tile_io_bytes + 3 * tile_rows * D * 4 + 2 * wb_bytes + (2 << 20)
    vmem_limit = int(max(16 << 20, min(vmem_need, vmem_cap - (8 << 20))))

    cost = pl.CostEstimate(
        flops=8 * B * E * S * D,
        transcendentals=2 * B * E * S,  # sqrt + reciprocal per row
        bytes_accessed=2 * B * E * S * D * dtype_bytes
        + 2 * E * D * jnp.dtype(weight.dtype).itemsize,
    )

    return pl.pallas_call(
        _block_expert_ln_kernel,
        out_shape=jax.ShapeDtypeStruct((B, E, S, D), x.dtype),
        grid_spec=pltpu.PrefetchScalarGridSpec(
            num_scalar_prefetch=0,
            # Expert outermost: the w/b block index is constant across all inner
            # (B-tile, S-tile) steps, so they are fetched once per expert.
            grid=(E, n_b, n_s),
            in_specs=[
                pl.BlockSpec((b_tile, None, s_tile, D),
                             lambda e, b, s: (b, e, s, 0)),
                pl.BlockSpec((None, 1, D), lambda e, b, s: (e, 0, 0)),
                pl.BlockSpec((None, 1, D), lambda e, b, s: (e, 0, 0)),
            ],
            out_specs=pl.BlockSpec((b_tile, None, s_tile, D),
                                   lambda e, b, s: (b, e, s, 0)),
        ),
        compiler_params=pltpu.CompilerParams(
            # Every output block is written exactly once -> all axes parallel
            # (lets megacore shard the grid on v7x).
            dimension_semantics=("parallel", "parallel", "parallel"),
            vmem_limit_bytes=vmem_limit,
        ),
        cost_estimate=cost,
    )(x, w3, b3)


def _reference(x, weight, bias):
    mean = jnp.mean(x, axis=-1, keepdims=True)
    var = jnp.mean((x - mean) ** 2, axis=-1, keepdims=True)
    std = jnp.sqrt(var)
    xn = (x - mean) / (std + EPS)
    return xn * weight[None, :, None, :] + bias[None, :, None, :]


if __name__ == "__main__":
    B, E, S, D = 2, 4, 64, 128  # small shapes; D lane-aligned, S multiple of 8

    key = jax.random.PRNGKey(0)
    kx, kw, kb = jax.random.split(key, 3)
    x = jax.random.normal(kx, (B, E, S, D), dtype=jnp.float32)
    # Module init is ones/zeros; perturb deterministically for a non-trivial check.
    weight = jnp.ones((E, D), jnp.float32) + 0.1 * jax.random.normal(kw, (E, D), jnp.float32)
    bias = jnp.zeros((E, D), jnp.float32) + 0.05 * jax.random.normal(kb, (E, D), jnp.float32)

    out = block_expert_layernorm(x, weight, bias)
    out = jax.block_until_ready(out)

    ref = _reference(x, weight, bias)
    assert out.shape == (B, E, S, D)
    assert jnp.allclose(out, ref, atol=1e-5, rtol=1e-5), "mismatch vs reference"

    print("KERNEL_OK")
</pallas_src>

<mosaic_0001>
module attributes {stable_mosaic.version = 11 : i64} {
  func.func @_block_expert_ln_kernel(%arg0: i32, %arg1: i32, %arg2: i32, %arg3: memref<2x1x64x128xf32, #tpu.memory_space<vmem>>, %arg4: memref<1x1x128xf32, #tpu.memory_space<vmem>>, %arg5: memref<1x1x128xf32, #tpu.memory_space<vmem>>, %arg6: memref<2x1x64x128xf32, #tpu.memory_space<vmem>>) attributes {dimension_semantics = [#tpu.dimension_semantics<parallel>, #tpu.dimension_semantics<parallel>, #tpu.dimension_semantics<parallel>], iteration_bounds = array<i64: 4, 1, 1>, scalar_prefetch = 0 : i64, scratch_operands = 0 : i64, tpu.core_type = #tpu.core_type<tc>, window_params = [{transform_indices = @transform_0, window_bounds = array<i64: 2, 1, 64, 128>}, {transform_indices = @transform_1, window_bounds = array<i64: 1, 1, 128>}, {transform_indices = @transform_2, window_bounds = array<i64: 1, 1, 128>}, {transform_indices = @transform_3, window_bounds = array<i64: 2, 1, 64, 128>}]} {
    %c0 = arith.constant 0 : index
    %c0_0 = arith.constant 0 : index
    %c0_1 = arith.constant 0 : index
    %c0_2 = arith.constant 0 : index
    %0 = vector.load %arg3[%c0, %c0_0, %c0_1, %c0_2] : memref<2x1x64x128xf32, #tpu.memory_space<vmem>>, vector<2x1x64x128xf32>
    %1 = vector.shape_cast %0 : vector<2x1x64x128xf32> to vector<2x64x128xf32>
    %cst = arith.constant dense<0.000000e+00> : vector<2x64xf32>
    %2 = vector.multi_reduction <add>, %1, %cst [2] : vector<2x64x128xf32> to vector<2x64xf32>
    %3 = vector.shape_cast %2 : vector<2x64xf32> to vector<2x64x1xf32>
    %cst_3 = arith.constant 1.280000e+02 : f32
    %4 = vector.broadcast %cst_3 : f32 to vector<2x64x1xf32>
    %5 = arith.divf %3, %4 : vector<2x64x1xf32>
    %6 = vector.broadcast %5 : vector<2x64x1xf32> to vector<2x64x128xf32>
    %7 = arith.subf %1, %6 : vector<2x64x128xf32>
    %8 = arith.mulf %7, %7 : vector<2x64x128xf32>
    %cst_4 = arith.constant dense<0.000000e+00> : vector<2x64xf32>
    %9 = vector.multi_reduction <add>, %8, %cst_4 [2] : vector<2x64x128xf32> to vector<2x64xf32>
    %10 = vector.shape_cast %9 : vector<2x64xf32> to vector<2x64x1xf32>
    %cst_5 = arith.constant 1.280000e+02 : f32
    %11 = vector.broadcast %cst_5 : f32 to vector<2x64x1xf32>
    %12 = arith.divf %10, %11 : vector<2x64x1xf32>
    %13 = math.sqrt %12 : vector<2x64x1xf32>
    %cst_6 = arith.constant 9.99999997E-7 : f32
    %14 = vector.broadcast %cst_6 : f32 to vector<2x64x1xf32>
    %15 = arith.addf %13, %14 : vector<2x64x1xf32>
    %cst_7 = arith.constant 1.000000e+00 : f32
    %16 = vector.broadcast %cst_7 : f32 to vector<2x64x1xf32>
    %17 = arith.divf %16, %15 : vector<2x64x1xf32>
    %18 = vector.broadcast %17 : vector<2x64x1xf32> to vector<2x64x128xf32>
    %19 = arith.mulf %7, %18 : vector<2x64x128xf32>
    %c0_8 = arith.constant 0 : index
    %c0_9 = arith.constant 0 : index
    %c0_10 = arith.constant 0 : index
    %20 = vector.load %arg4[%c0_8, %c0_9, %c0_10] : memref<1x1x128xf32, #tpu.memory_space<vmem>>, vector<1x1x128xf32>
    %21 = vector.shape_cast %20 : vector<1x1x128xf32> to vector<1x128xf32>
    %c0_11 = arith.constant 0 : index
    %c0_12 = arith.constant 0 : index
    %c0_13 = arith.constant 0 : index
    %22 = vector.load %arg5[%c0_11, %c0_12, %c0_13] : memref<1x1x128xf32, #tpu.memory_space<vmem>>, vector<1x1x128xf32>
    %23 = vector.shape_cast %22 : vector<1x1x128xf32> to vector<1x128xf32>
    %24 = vector.shape_cast %21 : vector<1x128xf32> to vector<1x1x128xf32>
    %25 = vector.broadcast %24 : vector<1x1x128xf32> to vector<2x64x128xf32>
    %26 = arith.mulf %19, %25 : vector<2x64x128xf32>
    %27 = vector.shape_cast %23 : vector<1x128xf32> to vector<1x1x128xf32>
    %28 = vector.broadcast %27 : vector<1x1x128xf32> to vector<2x64x128xf32>
    %29 = arith.addf %26, %28 : vector<2x64x128xf32>
    %c0_14 = arith.constant 0 : index
    %c0_15 = arith.constant 0 : index
    %c0_16 = arith.constant 0 : index
    %c0_17 = arith.constant 0 : index
    %30 = vector.load %arg6[%c0_14, %c0_15, %c0_16, %c0_17] : memref<2x1x64x128xf32, #tpu.memory_space<vmem>>, vector<2x1x64x128xf32>
    %31 = vector.shape_cast %30 : vector<2x1x64x128xf32> to vector<2x64x128xf32>
    %32 = vector.shape_cast %29 : vector<2x64x128xf32> to vector<2x1x64x128xf32>
    tpu.vector_store %arg6[%c0_14, %c0_15, %c0_16, %c0_17], %32 {strides = array<i32>} : memref<2x1x64x128xf32, #tpu.memory_space<vmem>>, vector<2x1x64x128xf32>,
    return
  }
  func.func @transform_0(%arg0: i32, %arg1: i32, %arg2: i32) -> (i32, i32, i32, i32) {
    %c0_i32 = arith.constant 0 : i32
    %c0_i32_0 = arith.constant 0 : i32
    return %arg1, %arg0, %arg2, %c0_i32 : i32, i32, i32, i32
  }
  func.func @transform_1(%arg0: i32, %arg1: i32, %arg2: i32) -> (i32, i32, i32) {
    %c0_i32 = arith.constant 0 : i32
    %c0_i32_0 = arith.constant 0 : i32
    %c0_i32_1 = arith.constant 0 : i32
    return %arg0, %c0_i32, %c0_i32_0 : i32, i32, i32
  }
  func.func @transform_2(%arg0: i32, %arg1: i32, %arg2: i32) -> (i32, i32, i32) {
    %c0_i32 = arith.constant 0 : i32
    %c0_i32_0 = arith.constant 0 : i32
    %c0_i32_1 = arith.constant 0 : i32
    return %arg0, %c0_i32, %c0_i32_0 : i32, i32, i32
  }
  func.func @transform_3(%arg0: i32, %arg1: i32, %arg2: i32) -> (i32, i32, i32, i32) {
    %c0_i32 = arith.constant 0 : i32
    %c0_i32_0 = arith.constant 0 : i32
    return %arg1, %arg0, %arg2, %c0_i32 : i32, i32, i32, i32
  }
}

</mosaic_0001>

<bundles_post_ra>
// kernel: tpu_custom_call.1
= control target key start
LH: loop header
LB: loop body
LE: loop exit
PB: predicated region body
PF: predicated region fallthrough
CT: control target
= control target key end

     0   :  { %s1637_s0 = inlined_call_operand.hbm [shape: f32[2,4,64,128], index: 0, kind: input, shape index: {}]   ;;  %s1638_s1 = inlined_call_operand.hbm [shape: f32[4,1,128], index: 1, kind: input, shape index: {}]   ;;  %s1639_s2 = inlined_call_operand.vmem [shape: f32[4,1,128], index: 2, kind: input, shape index: {}]   ;;  %s1640_s3 = inlined_call_operand.hbm [shape: f32[2,4,64,128], index: 3, kind: output, shape index: {}]  }
   0x1   :  { %1643 = sst [smem:[#allocation16_spill]] %s1637_s0 }
   0x2   :  { %8 = vsyncpa [#allocation3], 0 }
   0x3   :  { %10 = vsyncpa [#allocation3 + $0x1], 0 }
   0x4   :  { %11 = vsyncpa [#allocation6], 0 }
   0x5   :  { %13 = vsyncpa [#allocation6 + $0x1], 0 }
   0x6   :  { %14 = vsyncpa [#allocation4], 0 }
   0x7   :  { %16 = vsyncpa [#allocation4 + $0x1], 0  ;;  %s1141_s12 = smov 0   ;;  %s1143_s13 = smov 0  }
   0x8   :  { %s1145_s14 = smov 0   ;;  %s1147_s15 = smov 0  }
   0x9   :  { %s1149_s16 = smov 0   ;;  %s1151_s17 = smov 0  }
   0xa LB: > { %s852_s18 = sadd.s32 4294967295, %s1107_s17   ;;  %s853_s19 = sadd.s32 4294967294, %s1107_s17   ;;  %s1107_s17 = sphi %s1151_s17, %s22_s17   ;;  %s1103_s16 = sphi %s1149_s16, %s1656_s16   ;;  %s1099_s15 = sphi %s1147_s15, %s1655_s15   ;;  %s1095_s14 = sphi %s1145_s14, %s1654_s14   ;;  %s1091_s13 = sphi %s1143_s13, %s1653_s13   ;;  %s1087_s12 = sphi %s1141_s12, %s1652_s12  }
   0xb   : > { %s41_s20 = sadd.s32 1, %s1103_s16  ;;  %s52_s21 = sadd.s32 1, %s1095_s14 }
   0xc   : > { %p43_p0 = scmp.ge.s32.totalorder %s41_s20, 4  ;;  %p59_p1 = scmp.ne.s32.totalorder %s1095_s14, %s1091_s13 }
   0xd   : > { %p60_p2 = scmp.eq.s32.totalorder %s1107_s17, 0  ;;  %p65_p3 = scmp.ne.s32.totalorder %s1091_s13, %s1087_s12 }
   0xe   : > { %s1658_s20 = smov (%p43_p0, %s41_s20), 0  ;;  %p66_p5 = scmp.eq.s32.totalorder %s852_s18, 0 }
   0xf   : > { %p1182_p4 = por %p60_p2, %p59_p1  ;;  %s46_s23 = ssub.s32 %s1103_s16, %s1658_s20 }
  0x10   : > { %p145_p6 = scmp.eq.s32.totalorder %s852_s18, 3  ;;  %p50_p7 = scmp.eq.s32.totalorder %s46_s23, 0 }
  0x11   : > { %p1188_p8 = por %p66_p5, %p65_p3  ;;  %p151_p10 = scmp.eq.s32.totalorder %s853_s19, 3 }
  0x12   : > { %p1192_p9 = por %p145_p6, %p59_p1  ;;  %p855_p12 = scmp.ge.s32.totalorder %s1107_s17, 4 }
  0x13   : > { %s1645_s24 = scalar_select %p1188_p8, 1, 0 }
  0x14   : > { %s1646_s25 = scalar_select %p1192_p9, 1, 0 }
  0x15   : > { %s1197_s26 = scalar_select %p50_p7, %s1095_s14, %s52_s21  }
  0x16   : > { %p1199_p11 = por %p151_p10, %p65_p3  ;;  %167 = sbr.rel (%p855_p12) target bundleno = 66 (0x42), region = 16 }
  0x18   : > { %s1647_s27 = scalar_select %p1199_p11, 1, 0 }
  0x1d   : > { %s1205_s28 = sand.u32 1, %s1095_s14   ;;  %s872_s30 = sshll.u32 %s1103_s16, 10 }
  0x1e   : > { %s856_s29 = sshll.u32 %s1205_s28, 7  ;;  %s1648_s0 = sld [smem:[#allocation16_spill]] }
  0x1f   : > { %s874_s4 = scalar_select %p1182_p4, [#allocation0], [#allocation12] }
  0x20   : > { %s175_s9 = scalar_lea.vmem [#allocation2], %s856_s29  ;;  %s1109_s11 = smov 4096  }
  0x21   : > { %s191_s8 = sld [smem:[%s874_s4]]   ;;  %s199_s10 = sshll.u32 %s175_s9, 4  ;;  %s200_s10 = int_to_ptr.vmem [resolvable:$true] %s199_s10 }
  0x22   : > { %875 = sst [smem:[#allocation9]] (%p1182_p4), %s1109_s11  ;;  %s1110_s18 = smov 1024  }
  0x23   : > { %876 = sst [smem:[#allocation9 + $0x1]] (%p1182_p4), %s1110_s18  ;;  %s1111_s19 = smov 8  }
  0x24   : > { %s186_s7 = scalar_lea.hbm %s1648_s0, %s872_s30  ;;  %877 = sst [smem:[#allocation9 + $0x2]] (%p1182_p4), %s1111_s19 }
  0x25   : > { %s1112_s21 = smov 128   ;;  %880 = sst [smem:[#allocation9 + $0x5]] (%p1182_p4), %s1111_s19 }
  0x26   : > { %878 = sst [smem:[#allocation9 + $0x3]] (%p1182_p4), %s1112_s21  ;;  %s172_s30 = scalar_lea.sflag [#allocation3], %s1205_s28 }
  0x27   : > { %879 = sst [smem:[#allocation9 + $0x4]] (%p1182_p4), %s1112_s21  ;;  %s859_s23 = sshll.u32 %s191_s8, 26 }
  0x28   : > { %s860_s29 = sadd.s32 134217728, %s859_s23  ;;  %s1113_s4 = smov [#allocation8]  }
  0x29   : > { %881 = dma.general (%p1182_p4), %s186_s7, 2048, %s200_s10, %s172_s30, %s1113_s4, [#allocation9], %s860_s29, 0  }
  0x2a   : > { %s861_s5 = sshll.u32 %s1103_s16, 4  ;;  %s225_s6 = scalar_lea.vmem [#allocation5], %s1205_s28 }
  0x2b   : > { %s232_s9 = sshll.u32 %s225_s6, 4  ;;  %s1234_s0 = scalar_lea.hbm %s1638_s1, %s861_s5  ;;  %s233_s9 = int_to_ptr.vmem [resolvable:$true] %s232_s9 }
  0x2c   : > { %s223_s8 = scalar_lea.sflag [#allocation6], %s1205_s28  ;;  %s1021_s19 = scalar_lea.hbm %s1234_s0, 16 }
  0x2d   : > { %p1022_p13 = scmp.ne.s32.totalorder %s1234_s0, %s1021_s19  ;;  %s1025_s21 = scalar_lea.hbm %s1638_s1, 64 }
  0x2e   : > { %p1026_p2 = scmp.lt.u32.totalorder %s1234_s0, %s1638_s1  ;;  %p1027_p3 = scmp.lt.u32.totalorder %s1025_s21, %s1021_s19 }
  0x2f   : > { %p1023_p0 = pnand %p1022_p13, %p1182_p4  ;;  %p1029_p6 = scmp.lt.u32.totalorder %s1021_s19, %s1234_s0 }
  0x30   : > { %p1028_p5 = por %p1027_p3, %p1026_p2 }
  0x31   : > { %p1024_p1 = pneg %p1023_p0 }
  0x32   : > { %p1030_p7 = por %p1029_p6, %p1028_p5 }
  0x34   : > { %p1031_p10 = pnand %p1030_p7, %p1024_p1 }
  0x36   : > { %1034 = shalt.err (!%p1031_p10)
}
  0x37   : > { %s1035_s28 = scalar_lea.vmem %s233_s9, 16  ;;  %s1114_s30 = smov [#allocation5]  }
  0x38   : > { %p1036_p12 = scmp.ne.s32.totalorder %s233_s9, %s1035_s28  ;;  %s1039_s4 = sshll.u32 %s1114_s30, 4  ;;  %s1040_s4 = int_to_ptr.vmem [resolvable:$false] %s1039_s4 }
  0x39   : > { %s1041_s5 = scalar_lea.vmem %s1040_s4, 32  ;;  %p1042_p11 = scmp.lt.s32.totalorder %s233_s9, %s1040_s4 }
  0x3a   : > { %p1037_p13 = pnand %p1036_p12, %p1182_p4  ;;  %p1043_p9 = scmp.lt.s32.totalorder %s1041_s5, %s1035_s28 }
  0x3c   : > { %p1038_p0 = pneg %p1037_p13  ;;  %p1044_p8 = por %p1043_p9, %p1042_p11 }
  0x3e   : > { %p1045_p2 = pnand %p1044_p8, %p1038_p0 }
  0x40   : > { %1048 = shalt.err (!%p1045_p2)
}
  0x41   : > { %882 = dma.hbm_to_vmem [thread:$0]  (%p1182_p4), %s1234_s0, 16, %s233_s9, %s223_s8  }
  0x42 PF: > { %p862_p1 = scmp.ge.s32.totalorder %s1107_s17, 1  ;;  %p243_p3 = scmp.lt.s32.totalorder %s1107_s17, 5 }
  0x44   : > { %p244_p5 = pnand %p862_p1, %p243_p3 }
  0x45   : > { %s1257_s6 = sand.u32 (!%p244_p5), 1, %s1091_s13   ;;  %p1649_p4 = scmp.ne.s32.totalorder (!%p244_p5), %s1645_s24, 0 }
  0x46   : > { %247 = sbr.rel (%p244_p5) target bundleno = 462 (0x1ce), region = 32  ;;  %s863_s11 = sshll.u32 (!%p244_p5), %s1257_s6, 7 }
  0x47   : > { %s250_s18 = scalar_lea.sflag (!%p244_p5), [#allocation3], %s1257_s6  ;;  %s1263_s22 = scalar_lea.vmem (!%p244_p5), [#allocation2], %s863_s11 }
  0x4d   : > { %1074 = dma.done.wait (%p1649_p4), %s250_s18, 2048  }
  0x4e   : > { %1076 = vsyncadd (%p1649_p4), %s250_s18, 4294965248  ;;  %s259_s0 = scalar_lea.sflag [#allocation6], %s1257_s6  ;;  %s261_s9 = scalar_lea.vmem [#allocation5], %s1257_s6 }
  0x4f   : > { %1078 = dma.done.wait (%p1649_p4), %s259_s0, 16  }
  0x50   : > { %1080 = vsyncadd (%p1649_p4), %s259_s0, 4294967280  ;;  %v298_v0 = vld [vmem:[%s1263_s22] sm:$0xff]  ;;  %v300_v1 = vld [vmem:[%s1263_s22 + $0x10] sm:$0xff]  ;;  %p293_p8 = scmp.lt.s32.totalorder %s1099_s15, 3  ;;  %s1482_s10 = scalar_lea.vmem [#allocation7], %s863_s11 }
  0x51   : > { %314 = vadd.xlane.f32.xlu0 %v298_v0  ;;  %318 = vadd.xlane.f32.xlu1 %v300_v1  ;;  %v299_v2 = vld [vmem:[%s1263_s22 + $0x8] sm:$0xff]  ;;  %v301_v3 = vld [vmem:[%s1263_s22 + $0x18] sm:$0xff]  ;;  %v302_v4 = vld [vmem:[%s1263_s22 + $0x20] sm:$0xff]  ;;  %s682_s21 = scalar_lea.sflag [#allocation4], %s1257_s6 }
  0x52   : > { %v303_v5 = vld [vmem:[%s1263_s22 + $0x28] sm:$0xff]  ;;  %v304_v6 = vld [vmem:[%s1263_s22 + $0x30] sm:$0xff]  ;;  %v305_v7 = vld [vmem:[%s1263_s22 + $0x38] sm:$0xff]  ;;  %s1418_s24 = scalar_select %p293_p8, %s1099_s15, 3 }
  0x53   : > { %v306_v8 = vld [vmem:[%s1263_s22 + $0x40] sm:$0xff]  ;;  %v307_v9 = vld [vmem:[%s1263_s22 + $0x48] sm:$0xff]  ;;  %v308_v10 = vld [vmem:[%s1263_s22 + $0x50] sm:$0xff] }
  0x54   : > { %v1287_v11 = vld [vmem:[%s1263_s22 + $0x58] sm:$0xff]  ;;  %v1291_v12 = vld [vmem:[%s1263_s22 + $0x60] sm:$0xff]  ;;  %v1294_v13 = vld [vmem:[%s1263_s22 + $0x68] sm:$0xff]  ;;  %s295_s7 = scalar_lea.vmem %s1639_s2, %s1418_s24 }
  0x55   : > { %316 = vadd.xlane.f32.xlu0 %v299_v2  ;;  %320 = vadd.xlane.f32.xlu1 %v301_v3  ;;  %v1299_v14 = vld [vmem:[%s1263_s22 + $0x70] sm:$0xff]  ;;  %v1302_v15 = vld [vmem:[%s1263_s22 + $0x78] sm:$0xff] }
  0x59   : > { %322 = vadd.xlane.f32.xlu0 %v302_v4  ;;  %324 = vadd.xlane.f32.xlu1 %v303_v5 }
  0x5d   : > { %326 = vadd.xlane.f32.xlu0 %v304_v6  ;;  %328 = vadd.xlane.f32.xlu1 %v305_v7 }
  0x61   : > { %330 = vadd.xlane.f32.xlu0 %v306_v8  ;;  %332 = vadd.xlane.f32.xlu1 %v307_v9 }
  0x65   : > { %334 = vadd.xlane.f32.xlu0 %v308_v10  ;;  %336 = vadd.xlane.f32.xlu1 %v1287_v11 }
  0x69   : > { %338 = vadd.xlane.f32.xlu0 %v1291_v12  ;;  %340 = vadd.xlane.f32.xlu1 %v1294_v13 }
  0x6d   : > { %342 = vadd.xlane.f32.xlu0 %v1299_v14  ;;  %344 = vadd.xlane.f32.xlu1 %v1302_v15 }
  0xde   : > { %v315_v16 = vpop.xlane.xlu0 %314  ;;  %v319_v17 = vpop.xlane.xlu1 %318 }
  0xdf   : > { %v347_v18 = vmul.f32 0.0078125, %v315_v16  ;;  %v349_v19 = vmul.f32 0.0078125, %v319_v17 }
  0xe1   : > { %v1306_v20 = vsub.f32 %v298_v0, %v347_v18  ;;  %v1308_v21 = vsub.f32 %v300_v1, %v349_v19 }
  0xe2   : > { %v317_v22 = vpop.xlane.xlu0 %316  ;;  %v321_v23 = vpop.xlane.xlu1 %320 }
  0xe3   : > { %v348_v24 = vmul.f32 0.0078125, %v317_v22  ;;  %v379_v25 = vmul.f32 %v1306_v20, %v1306_v20  ;;  %v350_v26 = vmul.f32 0.0078125, %v321_v23  ;;  %v381_v29 = vmul.f32 %v1308_v21, %v1308_v21 }
  0xe5   : > { %v1312_v27 = vsub.f32 %v299_v2, %v348_v24  ;;  %395 = vadd.xlane.f32.xlu0 %v379_v25  ;;  %v1314_v28 = vsub.f32 %v301_v3, %v350_v26 }
  0xe6   : > { %v323_v30 = vpop.xlane.xlu0 %322  ;;  %v325_v31 = vpop.xlane.xlu1 %324 }
  0xe7   : > { %v351_v32 = vmul.f32 0.0078125, %v323_v30  ;;  %v380_v33 = vmul.f32 %v1312_v27, %v1312_v27  ;;  %v352_v34 = vmul.f32 0.0078125, %v325_v31  ;;  %v382_v37 = vmul.f32 %v1314_v28, %v1314_v28 }
  0xe9   : > { %v1320_v35 = vsub.f32 %v302_v4, %v351_v32  ;;  %399 = vadd.xlane.f32.xlu0 %v381_v29  ;;  %397 = vadd.xlane.f32.xlu1 %v380_v33  ;;  %v1322_v36 = vsub.f32 %v303_v5, %v352_v34 }
  0xea   : > { %v327_v38 = vpop.xlane.xlu0 %326  ;;  %v329_v39 = vpop.xlane.xlu1 %328 }
  0xeb   : > { %v353_v40 = vmul.f32 0.0078125, %v327_v38  ;;  %v383_v41 = vmul.f32 %v1320_v35, %v1320_v35  ;;  %v354_v42 = vmul.f32 0.0078125, %v329_v39  ;;  %v384_v45 = vmul.f32 %v1322_v36, %v1322_v36 }
  0xed   : > { %v1328_v43 = vsub.f32 %v304_v6, %v353_v40  ;;  %401 = vadd.xlane.f32.xlu1 %v382_v37  ;;  %403 = vadd.xlane.f32.xlu0 %v383_v41  ;;  %v1330_v44 = vsub.f32 %v305_v7, %v354_v42 }
  0xee   : > { %v331_v46 = vpop.xlane.xlu0 %330  ;;  %v333_v47 = vpop.xlane.xlu1 %332 }
  0xef   : > { %v355_v48 = vmul.f32 0.0078125, %v331_v46  ;;  %v385_v49 = vmul.f32 %v1328_v43, %v1328_v43  ;;  %v356_v50 = vmul.f32 0.0078125, %v333_v47  ;;  %v386_v53 = vmul.f32 %v1330_v44, %v1330_v44 }
  0xf1   : > { %v1336_v51 = vsub.f32 %v306_v8, %v355_v48  ;;  %405 = vadd.xlane.f32.xlu1 %v384_v45  ;;  %407 = vadd.xlane.f32.xlu0 %v385_v49  ;;  %v1338_v52 = vsub.f32 %v307_v9, %v356_v50 }
  0xf2   : > { %v335_v54 = vpop.xlane.xlu0 %334  ;;  %v337_v55 = vpop.xlane.xlu1 %336 }
  0xf3   : > { %v357_v56 = vmul.f32 0.0078125, %v335_v54  ;;  %v387_v57 = vmul.f32 %v1336_v51, %v1336_v51  ;;  %v358_v58 = vmul.f32 0.0078125, %v337_v55  ;;  %v388_v61 = vmul.f32 %v1338_v52, %v1338_v52 }
  0xf5   : > { %v1344_v59 = vsub.f32 %v308_v10, %v357_v56  ;;  %409 = vadd.xlane.f32.xlu1 %v386_v53  ;;  %411 = vadd.xlane.f32.xlu0 %v387_v57  ;;  %v1347_v60 = vsub.f32 %v1287_v11, %v358_v58 }
  0xf6   : > { %v339_v62 = vpop.xlane.xlu0 %338  ;;  %v341_v63 = vpop.xlane.xlu1 %340 }
  0xf7   : > { %v359_v0 = vmul.f32 0.0078125, %v339_v62  ;;  %v389_v1 = vmul.f32 %v1344_v59, %v1344_v59  ;;  %v360_v2 = vmul.f32 0.0078125, %v341_v63  ;;  %v390_v5 = vmul.f32 %v1347_v60, %v1347_v60 }
  0xf9   : > { %v1354_v3 = vsub.f32 %v1291_v12, %v359_v0  ;;  %413 = vadd.xlane.f32.xlu1 %v388_v61  ;;  %415 = vadd.xlane.f32.xlu0 %v389_v1  ;;  %v1357_v4 = vsub.f32 %v1294_v13, %v360_v2 }
  0xfa   : > { %v343_v6 = vpop.xlane.xlu0 %342  ;;  %v345_v7 = vpop.xlane.xlu1 %344 }
  0xfb   : > { %v361_v8 = vmul.f32 0.0078125, %v343_v6  ;;  %v391_v9 = vmul.f32 %v1354_v3, %v1354_v3  ;;  %v362_v10 = vmul.f32 0.0078125, %v345_v7  ;;  %v392_v13 = vmul.f32 %v1357_v4, %v1357_v4 }
  0xfd   : > { %v1364_v11 = vsub.f32 %v1299_v14, %v361_v8  ;;  %417 = vadd.xlane.f32.xlu1 %v390_v5  ;;  %419 = vadd.xlane.f32.xlu0 %v391_v9  ;;  %v1367_v12 = vsub.f32 %v1302_v15, %v362_v10 }
  0xff   : > { %v393_v16 = vmul.f32 %v1364_v11, %v1364_v11  ;;  %v394_v17 = vmul.f32 %v1367_v12, %v1367_v12 }
 0x101   : > { %421 = vadd.xlane.f32.xlu1 %v392_v13  ;;  %423 = vadd.xlane.f32.xlu0 %v393_v16 }
 0x105   : > { %425 = vadd.xlane.f32.xlu1 %v394_v17 }
 0x172   : > { %v396_v18 = vpop.xlane.xlu0 %395 }
 0x173   : > { %v427_v14 = vmul.f32 0.0078125, %v396_v18 }
 0x175   : > { %957 = vrsqrt.f32 %v427_v14  ;;  %vm445_vm0 = vcmp.eq.f32.partialorder %v427_v14, inf  ;;  %vm447_vm1 = vcmp.eq.f32.partialorder %v427_v14, 0.0  ;;  %v448_v38 = vand.u32 2147483648, %v427_v14 }
 0x176   : > { %v398_v19 = vpop.xlane.xlu1 %397  ;;  %v400_v22 = vpop.xlane.xlu0 %399 }
 0x177   : > { %v428_v23 = vmul.f32 0.0078125, %v398_v19  ;;  %v429_v15 = vmul.f32 0.0078125, %v400_v22 }
 0x179   : > { %959 = vrsqrt.f32 %v428_v23  ;;  %vm452_vm2 = vcmp.eq.f32.partialorder %v428_v23, inf  ;;  %vm454_vm3 = vcmp.eq.f32.partialorder %v428_v23, 0.0  ;;  %v455_v40 = vand.u32 2147483648, %v428_v23 }
 0x17a   : > { %961 = vrsqrt.f32 %v429_v15  ;;  %v402_v24 = vpop.xlane.xlu1 %401  ;;  %v404_v25 = vpop.xlane.xlu0 %403  ;;  %vm459_vm4 = vcmp.eq.f32.partialorder %v429_v15, inf  ;;  %vm461_vm5 = vcmp.eq.f32.partialorder %v429_v15, 0.0  ;;  %v462_v54 = vand.u32 2147483648, %v429_v15 }
 0x17b   : > { %v1375_v26 = vmul.f32 0.0078125, %v402_v24  ;;  %v1377_v29 = vmul.f32 0.0078125, %v404_v25 }
 0x17d   : > { %963 = vrsqrt.f32 %v1375_v26  ;;  %vm466_vm6 = vcmp.eq.f32.partialorder %v1375_v26, inf  ;;  %vm468_vm7 = vcmp.eq.f32.partialorder %v1375_v26, 0.0  ;;  %v469_v56 = vand.u32 2147483648, %v1375_v26 }
 0x17e   : > { %965 = vrsqrt.f32 %v1377_v29  ;;  %v406_v30 = vpop.xlane.xlu1 %405  ;;  %v408_v31 = vpop.xlane.xlu0 %407  ;;  %vm473_vm8 = vcmp.eq.f32.partialorder %v1377_v29, inf  ;;  %vm475_vm9 = vcmp.eq.f32.partialorder %v1377_v29, 0.0  ;;  %v476_v0 = vand.u32 2147483648, %v1377_v29 }
 0x17f   : > { %v958_v32 = vpop.eup %957  ;;  %v1381_v33 = vmul.f32 0.0078125, %v406_v30  ;;  %v1383_v34 = vmul.f32 0.0078125, %v408_v31 }
 0x180   : > { %v444_v37 = vmul.f32 %v958_v32, %v427_v14 }
 0x181   : > { %967 = vrsqrt.f32 %v1381_v33  ;;  %vm480_vm10 = vcmp.eq.f32.partialorder %v1381_v33, inf  ;;  %vm482_vm11 = vcmp.eq.f32.partialorder %v1381_v33, 0.0  ;;  %v483_v16 = vand.u32 2147483648, %v1381_v33 }
 0x182   : > { %v446_v39 = vsel %vm445_vm0, %v427_v14, %v444_v37  ;;  %969 = vrsqrt.f32 %v1383_v34  ;;  %v410_v41 = vpop.xlane.xlu1 %409  ;;  %v412_v42 = vpop.xlane.xlu0 %411  ;;  %vm487_vm12 = vcmp.eq.f32.partialorder %v1383_v34, inf  ;;  %vm489_vm13 = vcmp.eq.f32.partialorder %v1383_v34, 0.0 }
 0x183   : > { %v960_v45 = vpop.eup %959  ;;  %v449_v46 = vsel %vm447_vm1, %v448_v38, %v446_v39  ;;  %v1387_v47 = vmul.f32 0.0078125, %v410_v41  ;;  %v1389_v48 = vmul.f32 0.0078125, %v412_v42  ;;  %v490_v31 = vand.u32 2147483648, %v1383_v34  ;;  %v1451_v41 = vld [vmem:[%s261_s9] ss:$0 sm:$0xff] }
 0x184   : > { %v962_v49 = vpop.eup %961  ;;  %v555_v50 = vadd.f32 1e-06, %v449_v46  ;;  %v451_v53 = vmul.f32 %v960_v45, %v428_v23 }
 0x185   : > { %v458_v55 = vmul.f32 %v962_v49, %v429_v15  ;;  %971 = vrsqrt.f32 %v1387_v47  ;;  %vm494_vm14 = vcmp.eq.f32.partialorder %v1387_v47, inf  ;;  %vm496_vm15 = vcmp.eq.f32.partialorder %v1387_v47, 0.0 }
 0x186   : > { %973 = vrcp.f32 %v555_v50  ;;  %v453_v57 = vsel %vm452_vm2, %v428_v23, %v451_v53  ;;  %v414_v58 = vpop.xlane.xlu1 %413  ;;  %v416_v7 = vpop.xlane.xlu0 %415  ;;  %v497_v39 = vand.u32 2147483648, %v1387_v47  ;;  %vm501_vm0 = vcmp.eq.f32.partialorder %v1389_v48, inf }
 0x187   : > { %v964_v61 = vpop.eup %963  ;;  %v456_v62 = vsel %vm454_vm3, %v455_v40, %v453_v57  ;;  %v460_v63 = vsel %vm459_vm4, %v429_v15, %v458_v55  ;;  %975 = vrsqrt.f32 %v1389_v48  ;;  %v1408_v10 = vmul.f32 0.0078125, %v414_v58 }
 0x188   : > { %v966_v1 = vpop.eup %965  ;;  %v556_v2 = vadd.f32 1e-06, %v456_v62  ;;  %v463_v5 = vsel %vm461_vm5, %v462_v54, %v460_v63  ;;  %v465_v6 = vmul.f32 %v964_v61, %v1375_v26  ;;  %v1425_v19 = vmul.f32 0.0078125, %v416_v7  ;;  %v1459_v54 = vld [vmem:[%s295_s7] ss:$0 sm:$0xff] }
 0x189   : > { %v557_v8 = vadd.f32 1e-06, %v463_v5  ;;  %v472_v9 = vmul.f32 %v966_v1, %v1377_v29  ;;  %v504_v57 = vand.u32 2147483648, %v1389_v48  ;;  %vm503_vm1 = vcmp.eq.f32.partialorder %v1389_v48, 0.0 }
 0x18a   : > { %977 = vrcp.f32 %v556_v2  ;;  %v467_v13 = vsel %vm466_vm6, %v1375_v26, %v465_v6  ;;  %v418_v25 = vpop.xlane.xlu1 %417  ;;  %v420_v49 = vpop.xlane.xlu0 %419  ;;  %vm508_vm2 = vcmp.eq.f32.partialorder %v1408_v10, inf  ;;  %vm510_vm3 = vcmp.eq.f32.partialorder %v1408_v10, 0.0 }
 0x18b   : > { %v968_v17 = vpop.eup %967  ;;  %979 = vrcp.f32 %v557_v8  ;;  %v470_v18 = vsel %vm468_vm7, %v469_v56, %v467_v13  ;;  %v474_v14 = vsel %vm473_vm8, %v1377_v29, %v472_v9  ;;  %v1469_v62 = vmul.f32 0.0078125, %v420_v49 }
 0x18c   : > { %v970_v22 = vpop.eup %969  ;;  %v558_v23 = vadd.f32 1e-06, %v470_v18  ;;  %v477_v15 = vsel %vm475_vm9, %v476_v0, %v474_v14  ;;  %v479_v24 = vmul.f32 %v968_v17, %v1381_v33  ;;  %981 = vrsqrt.f32 %v1408_v10 }
 0x18d   : > { %v559_v26 = vadd.f32 1e-06, %v477_v15  ;;  %v486_v30 = vmul.f32 %v970_v22, %v1383_v34  ;;  %v511_v17 = vand.u32 2147483648, %v1408_v10  ;;  %vm515_vm4 = vcmp.eq.f32.partialorder %v1425_v19, inf }
 0x18e   : > { %983 = vrcp.f32 %v558_v23  ;;  %v481_v32 = vsel %vm480_vm10, %v1381_v33, %v479_v24  ;;  %v422_v58 = vpop.xlane.xlu1 %421  ;;  %v424_v15 = vpop.xlane.xlu0 %423  ;;  %vm517_vm5 = vcmp.eq.f32.partialorder %v1425_v19, 0.0  ;;  %vm529_vm8 = vcmp.eq.f32.partialorder %v1469_v62, inf }
 0x18f   : > { %v972_v29 = vpop.eup %971  ;;  %985 = vrcp.f32 %v559_v26  ;;  %v484_v37 = vsel %vm482_vm11, %v483_v16, %v481_v32  ;;  %v488_v38 = vsel %vm487_vm12, %v1383_v34, %v486_v30  ;;  %v1457_v34 = vmul.f32 0.0078125, %v418_v25 }
 0x190   : > { %v974_v40 = vpop.eup %973  ;;  %v560_v42 = vadd.f32 1e-06, %v484_v37  ;;  %v491_v45 = vsel %vm489_vm13, %v490_v31, %v488_v38  ;;  %v493_v46 = vmul.f32 %v972_v29, %v1387_v47  ;;  %987 = vrsqrt.f32 %v1425_v19 }
 0x191   : > { %v976_v50 = vpop.eup %975  ;;  %v603_v33 = vmul.f32 %v974_v40, %v1306_v20  ;;  %v561_v53 = vadd.f32 1e-06, %v491_v45  ;;  %v1476_v8 = vmul.f32 0.0078125, %v422_v58  ;;  %v518_v37 = vand.u32 2147483648, %v1425_v19 }
 0x192   : > { %989 = vrcp.f32 %v560_v42  ;;  %v495_v55 = vsel %vm494_vm14, %v1387_v47, %v493_v46  ;;  %v500_v56 = vmul.f32 %v976_v50, %v1389_v48  ;;  %v426_v24 = vpop.xlane.xlu1 %425  ;;  %vm522_vm6 = vcmp.eq.f32.partialorder %v1457_v34, inf }
 0x193   : > { %v627_v61 = vmul.f32 %v1451_v41, %v603_v33  ;;  %991 = vrcp.f32 %v561_v53  ;;  %v498_v20 = vsel %vm496_vm15, %v497_v39, %v495_v55  ;;  %vm524_vm7 = vcmp.eq.f32.partialorder %v1457_v34, 0.0 }
 0x194   : > { %v978_v63 = vpop.eup %977  ;;  %v562_v0 = vadd.f32 1e-06, %v498_v20  ;;  %v502_v1 = vsel %vm501_vm0, %v1389_v48, %v500_v56  ;;  %993 = vrsqrt.f32 %v1457_v34  ;;  %vm531_vm9 = vcmp.eq.f32.partialorder %v1469_v62, 0.0 }
 0x195   : > { %v980_v2 = vpop.eup %979  ;;  %v649_v5 = vadd.f32 %v1459_v54, %v627_v61  ;;  %v604_v6 = vmul.f32 %v978_v63, %v1312_v27  ;;  %v505_v7 = vsel %vm503_vm1, %v504_v57, %v502_v1  ;;  %vm536_vm10 = vcmp.eq.f32.partialorder %v1476_v8, inf }
 0x196   : > { %v982_v47 = vpop.eup %981  ;;  %v605_v9 = vmul.f32 %v980_v2, %v1308_v21  ;;  %995 = vrcp.f32 %v562_v0  ;;  %v563_v13 = vadd.f32 1e-06, %v505_v7  ;;  %vm538_vm11 = vcmp.eq.f32.partialorder %v1476_v8, 0.0 }
 0x197   : > { %665 = vst [vmem:[%s1482_s10] sm:$0xff] %v649_v5  ;;  %v628_v48 = vmul.f32 %v1451_v41, %v604_v6  ;;  %v507_v16 = vmul.f32 %v982_v47, %v1408_v10  ;;  %997 = vrsqrt.f32 %v1469_v62 }
 0x198   : > { %v984_v27 = vpop.eup %983  ;;  %v629_v21 = vmul.f32 %v1451_v41, %v605_v9  ;;  %999 = vrcp.f32 %v563_v13  ;;  %v532_v9 = vand.u32 2147483648, %v1469_v62 }
 0x199   : > { %v986_v18 = vpop.eup %985  ;;  %v650_v14 = vadd.f32 %v1459_v54, %v628_v48  ;;  %v606_v22 = vmul.f32 %v984_v27, %v1314_v28  ;;  %v509_v23 = vsel %vm508_vm2, %v1408_v10, %v507_v16  ;;  %1001 = vrsqrt.f32 %v1476_v8 }
 0x19a   : > { %v988_v25 = vpop.eup %987  ;;  %v651_v26 = vadd.f32 %v1459_v54, %v629_v21  ;;  %v607_v30 = vmul.f32 %v986_v18, %v1320_v35  ;;  %v512_v31 = vsel %vm510_vm3, %v511_v17, %v509_v23  ;;  %v1508_v35 = vmul.f32 0.0078125, %v424_v15 }
 0x19b   : > { %666 = vst [vmem:[%s1482_s10 + $0x8] sm:$0xff] %v650_v14  ;;  %v630_v28 = vmul.f32 %v1451_v41, %v606_v22  ;;  %v564_v32 = vadd.f32 1e-06, %v512_v31  ;;  %v514_v29 = vmul.f32 %v988_v25, %v1425_v19  ;;  %v1510_v10 = vmul.f32 0.0078125, %v426_v24 }
 0x19c   : > { %v990_v38 = vpop.eup %989  ;;  %667 = vst [vmem:[%s1482_s10 + $0x10] sm:$0xff] %v651_v26  ;;  %v631_v39 = vmul.f32 %v1451_v41, %v607_v30  ;;  %v539_v48 = vand.u32 2147483648, %v1476_v8  ;;  %vm543_vm12 = vcmp.eq.f32.partialorder %v1508_v35, inf  ;;  %vm545_vm13 = vcmp.eq.f32.partialorder %v1508_v35, 0.0 }
 0x19d   : > { %v992_v40 = vpop.eup %991  ;;  %v652_v42 = vadd.f32 %v1459_v54, %v630_v28  ;;  %v608_v45 = vmul.f32 %v990_v38, %v1322_v36  ;;  %1003 = vrcp.f32 %v564_v32  ;;  %v516_v46 = vsel %vm515_vm4, %v1425_v19, %v514_v29 }
 0x19e   : > { %v994_v49 = vpop.eup %993  ;;  %v653_v50 = vadd.f32 %v1459_v54, %v631_v39  ;;  %v609_v33 = vmul.f32 %v992_v40, %v1328_v43  ;;  %v519_v53 = vsel %vm517_vm5, %v518_v37, %v516_v46  ;;  %1005 = vrsqrt.f32 %v1508_v35 }
 0x19f   : > { %668 = vst [vmem:[%s1482_s10 + $0x18] sm:$0xff] %v652_v42  ;;  %v632_v55 = vmul.f32 %v1451_v41, %v608_v45  ;;  %v565_v56 = vadd.f32 1e-06, %v519_v53  ;;  %v521_v36 = vmul.f32 %v994_v49, %v1457_v34  ;;  %v525_v43 = vand.u32 2147483648, %v1457_v34 }
 0x1a0   : > { %v996_v57 = vpop.eup %995  ;;  %669 = vst [vmem:[%s1482_s10 + $0x20] sm:$0xff] %v653_v50  ;;  %v633_v58 = vmul.f32 %v1451_v41, %v609_v33  ;;  %1007 = vrsqrt.f32 %v1510_v10  ;;  %vm550_vm14 = vcmp.eq.f32.partialorder %v1510_v10, inf  ;;  %v553_v37 = vand.u32 2147483648, %v1510_v10 }
 0x1a1   : > { %v998_v19 = vpop.eup %997  ;;  %v654_v61 = vadd.f32 %v1459_v54, %v632_v55  ;;  %v610_v20 = vmul.f32 %v996_v57, %v1330_v44  ;;  %1009 = vrcp.f32 %v565_v56  ;;  %v523_v63 = vsel %vm522_vm6, %v1457_v34, %v521_v36 }
 0x1a2   : > { %v1000_v0 = vpop.eup %999  ;;  %v655_v1 = vadd.f32 %v1459_v54, %v633_v58  ;;  %v526_v2 = vsel %vm524_vm7, %v525_v43, %v523_v63  ;;  %v528_v5 = vmul.f32 %v998_v19, %v1469_v62  ;;  %vm552_vm15 = vcmp.eq.f32.partialorder %v1510_v10, 0.0 }
 0x1a3   : > { %v1002_v6 = vpop.eup %1001  ;;  %670 = vst [vmem:[%s1482_s10 + $0x28] sm:$0xff] %v654_v61  ;;  %v634_v7 = vmul.f32 %v1451_v41, %v610_v20  ;;  %v611_v47 = vmul.f32 %v1000_v0, %v1336_v51  ;;  %v566_v44 = vadd.f32 1e-06, %v526_v2 }
 0x1a4   : > { %671 = vst [vmem:[%s1482_s10 + $0x30] sm:$0xff] %v655_v1  ;;  %v530_v34 = vsel %vm529_vm8, %v1469_v62, %v528_v5  ;;  %v535_v13 = vmul.f32 %v1002_v6, %v1476_v8 }
 0x1a5   : > { %v656_v16 = vadd.f32 %v1459_v54, %v634_v7  ;;  %v635_v51 = vmul.f32 %v1451_v41, %v611_v47  ;;  %1011 = vrcp.f32 %v566_v44  ;;  %v533_v27 = vsel %vm531_vm9, %v532_v9, %v530_v34 }
 0x1a6   : > { %v567_v21 = vadd.f32 1e-06, %v533_v27  ;;  %v537_v17 = vsel %vm536_vm10, %v1476_v8, %v535_v13  ;;  %v546_v8 = vand.u32 2147483648, %v1508_v35 }
 0x1a7   : > { %v1004_v18 = vpop.eup %1003  ;;  %672 = vst [vmem:[%s1482_s10 + $0x38] sm:$0xff] %v656_v16  ;;  %v657_v62 = vadd.f32 %v1459_v54, %v635_v51  ;;  %v540_v14 = vsel %vm538_vm11, %v539_v48, %v537_v17 }
 0x1a8   : > { %v1006_v22 = vpop.eup %1005  ;;  %v612_v23 = vmul.f32 %v1004_v18, %v1338_v52  ;;  %1013 = vrcp.f32 %v567_v21  ;;  %v568_v15 = vadd.f32 1e-06, %v540_v14 }
 0x1a9   : > { %673 = vst [vmem:[%s1482_s10 + $0x40] sm:$0xff] %v657_v62  ;;  %v542_v24 = vmul.f32 %v1006_v22, %v1508_v35 }
 0x1aa   : > { %v1008_v25 = vpop.eup %1007  ;;  %v636_v26 = vmul.f32 %v1451_v41, %v612_v23  ;;  %1015 = vrcp.f32 %v568_v15 }
 0x1ab   : > { %v1010_v30 = vpop.eup %1009  ;;  %v544_v31 = vsel %vm543_vm12, %v1508_v35, %v542_v24  ;;  %v549_v52 = vmul.f32 %v1008_v25, %v1510_v10 }
 0x1ac   : > { %v658_v28 = vadd.f32 %v1459_v54, %v636_v26  ;;  %v613_v32 = vmul.f32 %v1010_v30, %v1344_v59  ;;  %v547_v29 = vsel %vm545_vm13, %v546_v8, %v544_v31 }
 0x1ad   : > { %v569_v38 = vadd.f32 1e-06, %v547_v29  ;;  %v551_v39 = vsel %vm550_vm14, %v1510_v10, %v549_v52 }
 0x1ae   : > { %674 = vst [vmem:[%s1482_s10 + $0x48] sm:$0xff] %v658_v28  ;;  %v637_v35 = vmul.f32 %v1451_v41, %v613_v32  ;;  %v554_v40 = vsel %vm552_vm15, %v553_v37, %v551_v39 }
 0x1af   : > { %v1012_v42 = vpop.eup %1011  ;;  %1017 = vrcp.f32 %v569_v38  ;;  %v570_v45 = vadd.f32 1e-06, %v554_v40 }
 0x1b0   : > { %v659_v59 = vadd.f32 %v1459_v54, %v637_v35  ;;  %v614_v46 = vmul.f32 %v1012_v42, %v1347_v60 }
 0x1b1   : > { %1019 = vrcp.f32 %v570_v45 }
 0x1b2   : > { %v1014_v49 = vpop.eup %1013  ;;  %675 = vst [vmem:[%s1482_s10 + $0x50] sm:$0xff] %v659_v59  ;;  %v638_v50 = vmul.f32 %v1451_v41, %v614_v46 }
 0x1b3   : > { %v615_v10 = vmul.f32 %v1014_v49, %v1354_v3 }
 0x1b4   : > { %v1016_v33 = vpop.eup %1015  ;;  %v660_v53 = vadd.f32 %v1459_v54, %v638_v50 }
 0x1b5   : > { %v639_v55 = vmul.f32 %v1451_v41, %v615_v10  ;;  %v616_v56 = vmul.f32 %v1016_v33, %v1357_v4 }
 0x1b6   : > { %676 = vst [vmem:[%s1482_s10 + $0x58] sm:$0xff] %v660_v53 }
 0x1b7   : > { %v661_v60 = vadd.f32 %v1459_v54, %v639_v55  ;;  %v640_v36 = vmul.f32 %v1451_v41, %v616_v56 }
 0x1b9   : > { %v1018_v57 = vpop.eup %1017  ;;  %677 = vst [vmem:[%s1482_s10 + $0x60] sm:$0xff] %v661_v60  ;;  %v662_v58 = vadd.f32 %v1459_v54, %v640_v36 }
 0x1ba   : > { %v617_v3 = vmul.f32 %v1018_v57, %v1364_v11 }
 0x1bb   : > { %v1020_v43 = vpop.eup %1019  ;;  %678 = vst [vmem:[%s1482_s10 + $0x68] sm:$0xff] %v662_v58 }
 0x1bc   : > { %v641_v19 = vmul.f32 %v1451_v41, %v617_v3  ;;  %v618_v61 = vmul.f32 %v1020_v43, %v1367_v12 }
 0x1be   : > { %v663_v4 = vadd.f32 %v1459_v54, %v641_v19  ;;  %v642_v20 = vmul.f32 %v1451_v41, %v618_v61 }
 0x1c0   : > { %679 = vst [vmem:[%s1482_s10 + $0x70] sm:$0xff] %v663_v4  ;;  %v664_v63 = vadd.f32 %v1459_v54, %v642_v20 }
 0x1c2   : > { %680 = vst [vmem:[%s1482_s10 + $0x78] sm:$0xff] %v664_v63 }
 0x1c3   : > { %s873_s23 = sshll.u32 %s1099_s15, 10  ;;  %s716_s29 = sshll.u32 %s1482_s10, 4  ;;  %s717_s29 = int_to_ptr.vmem [resolvable:$true] %s716_s29 }
 0x1c4   : > { %s699_s4 = scalar_lea.hbm %s1640_s3, %s873_s23  ;;  %s1115_s5 = smov 1024  }
 0x1c5   : > { %p1650_p9 = scmp.ne.s32.totalorder %s1646_s25, 0  ;;  %s1116_s6 = smov 4096  }
 0x1c6   : > { %s1117_s11 = smov 8   ;;  %s1118_s18 = smov 128  }
 0x1c7   : > { %885 = sst [smem:[#allocation11]] (%p1650_p9), %s1115_s5  ;;  %s1119_s15 = smov [#allocation10]  }
 0x1c8   : > { %886 = sst [smem:[#allocation11 + $0x1]] (%p1650_p9), %s1116_s6  ;;  %s1120_s22 = smov 0  }
 0x1c9   : > { %887 = sst [smem:[#allocation11 + $0x2]] (%p1650_p9), %s1117_s11 }
 0x1ca   : > { %888 = sst [smem:[#allocation11 + $0x3]] (%p1650_p9), %s1118_s18 }
 0x1cb   : > { %889 = sst [smem:[#allocation11 + $0x4]] (%p1650_p9), %s1118_s18 }
 0x1cc   : > { %890 = sst [smem:[#allocation11 + $0x5]] (%p1650_p9), %s1117_s11 }
 0x1cd   : > { %891 = dma.general (%p1650_p9), %s717_s29, 2048, %s699_s4, %s682_s21, %s1119_s15, [#allocation11], %s1120_s22, 0  }
 0x1ce PF: > { %p897_p11 = scmp.ge.s32.totalorder %s1107_s17, 2  ;;  %s744_s0 = sand.u32 1, %s1087_s12  }
 0x1cf   : > { %p1651_p6 = scmp.ne.s32.totalorder %s1647_s27, 0  ;;  %s745_s9 = scalar_lea.sflag [#allocation4], %s744_s0 }
 0x1d1   : > { %p894_p7 = pnand %p897_p11, %p1651_p6 }
 0x1d3   : > { %1082 = dma.done.wait (!%p894_p7), %s745_s9, 2048  }
 0x1d4   : > { %1084 = vsyncadd (!%p894_p7), %s745_s9, 4294965248  ;;  %s22_s17 = sadd.s32 1, %s1107_s17   ;;  %s1652_s12 = smov %s1091_s13 }
 0x1d5   : > { %p19_p10 = scmp.ge.s32.totalorder %s22_s17, 6   ;;  %s1653_s13 = smov %s1095_s14 }
 0x1d6   : > { %s1654_s14 = smov %s1197_s26  ;;  %s1655_s15 = smov %s1103_s16 }
 0x1d7   : > { %s1656_s16 = smov %s1658_s20  ;;  %21 = sbr.rel (!%p19_p10) target bundleno = 10 (0xa), region = 103 }
 0x1de   :  { %750 = vsyncpa [#allocation3], 1 }
 0x1df   :  { %752 = vsyncpa [#allocation3 + $0x1], 1 }
 0x1e0   :  { %753 = vsyncpa [#allocation6], 1 }
 0x1e1   :  { %755 = vsyncpa [#allocation6 + $0x1], 1 }
 0x1e2   :  { %756 = vsyncpa [#allocation4], 1 }
 0x1e3   :  { %758 = vsyncpa [#allocation4 + $0x1], 1 }

</bundles_post_ra>
